<compile_context>
chip_gen: v5e
topology: v5e:2x2
jax: 0.10.0
libtpu: 0.0.40
codegen_flags: <defaults>
</compile_context>

<pallas_src>
import jax
import jax.numpy as jnp
import numpy as np
from jax.experimental import pallas as pl
from jax.experimental.pallas import tpu as pltpu


def _round_up(v, m):
    return ((v + m - 1) // m) * m


def _cdiv(a, b):
    return (a + b - 1) // b


# ----------------------------- Pallas kernel --------------------------------
def _make_convT_kernel(shifts, tm):
    """Builds the 4 shift taps in VMEM from a halo-tiled read, then 4 small MXU dots.

    w_ref : (4, 4*Cout, Cin) bf16   per-tap parity-plane weight blocks
    b_ref : (4*Cout, 1)      f32    bias replicated across the 4 parity planes
    xm_ref: (Cin, tm)        bf16   main lane tile of the flattened padded input
    xh_ref: (Cin, th)        bf16   right halo (next th lanes of the same input)
    o_ref : (4*Cout, tm)     bf16   lane-dense output tile (tm multiple of 128)
    """
    def kernel(w_ref, b_ref, xm_ref, xh_ref, o_ref):
        full = jnp.concatenate([xm_ref[...], xh_ref[...]], axis=-1)   # (Cin, tm+th)
        acc = jnp.zeros(o_ref.shape, jnp.float32)
        for t, s in enumerate(shifts):                                # static 4-way unroll
            acc += jnp.dot(w_ref[t], full[:, s:s + tm],
                           preferred_element_type=jnp.float32)
        o_ref[...] = (acc + b_ref[...]).astype(o_ref.dtype)
    return kernel


def _parity_gemm(w4, bias4, xf, *, tm, th, ng, shifts):
    n_tap, co4, cin = w4.shape
    hb = tm // th                                   # halo block stride in units of th
    return pl.pallas_call(
        _make_convT_kernel(shifts, tm),
        out_shape=jax.ShapeDtypeStruct((co4, ng * tm), jnp.bfloat16),
        grid_spec=pltpu.PrefetchScalarGridSpec(
            num_scalar_prefetch=0,
            grid=(ng,),
            in_specs=[
                pl.BlockSpec((n_tap, co4, cin), lambda j: (0, 0, 0)),  # resident weights
                pl.BlockSpec((co4, 1), lambda j: (0, 0)),              # resident bias
                pl.BlockSpec((cin, tm), lambda j: (0, j)),             # main lane tile
                pl.BlockSpec((cin, th), lambda j: (0, (j + 1) * hb)),  # right halo tile
            ],
            out_specs=pl.BlockSpec((co4, tm), lambda j: (0, j)),
        ),
        compiler_params=pltpu.CompilerParams(
            dimension_semantics=("parallel",)),
        # TODO(synk): production FC-DenseNet channel counts need Cout/Cin grid tiling
        # (K reduction axis last + "arbitrary" + f32 VMEM accumulator with pl.when
        # init/finalize), sized against v7x's 64 MiB VMEM via vmem_limit_bytes, with
        # 256-aligned operand tiles on v6e/v7x and 128-aligned on v5e; the structurally
        # zero parity rows in w4 (7/16 of the MACs) only matter once that regime is
        # MXU-bound.  pipeline_mode=pl.Buffered(3) on the main tile is a further option
        # if DMA issue latency shows in xprof.
    )(w4, bias4, xf, xf)


# ------------------------------ wrapper --------------------------------------
@jax.jit
def transition_up(x_nchw, skip_nchw, w_t, b):
    """TransitionUp forward (matches the PyTorch module, NCHW in / NCHW out).

    x_nchw    : (N, Cin, H, W)
    skip_nchw : (N, Cskip, Hs, Ws)
    w_t       : (Cin, Cout, 3, 3)   PyTorch ConvTranspose2d weight layout
    b         : (Cout,)
    returns   : (N, Cout + Cskip, Hs, Ws)
    """
    N, Cin, H, W = x_nchw.shape
    _, Cskip, Hs, Ws = skip_nchw.shape
    Cout = w_t.shape[1]
    out_dtype = x_nchw.dtype
    Hf, Wf = 2 * H + 1, 2 * W + 1           # full transposed-conv output size
    r0 = (Hf - Hs) // 2                      # center_crop offsets (PyTorch semantics)
    c0 = (Wf - Ws) // 2

    Wp = W + 2                               # padded width
    M2 = (H + 2) * Wp                        # flattened padded spatial size per image
    total_q = N * M2                         # batch folded into the lane (pixel) dim

    # Lane-tile sizing: the halo tile th must cover the largest tap offset (W+3); aim for
    # >= 2 grid steps (v7x: 2 TensorCores) while capping the lane tile at 1024.
    th = _round_up(W + 3, 128)
    tm = _round_up(max(th, min(1024, _round_up(_cdiv(total_q, 2), 128))), th)
    ng = _cdiv(total_q, tm)
    Mfp = (ng + 1) * tm                      # +1 tile so the right-halo block always exists

    # ---- flattened zero-padded input: channels on sublanes, batch*spatial on lanes -----
    xb = x_nchw.astype(jnp.bfloat16)
    xp = jnp.pad(xb, ((0, 0), (0, 0), (1, 1), (1, 1)))             # (N, Cin, H+2, W+2)
    xf = jnp.transpose(xp, (1, 0, 2, 3)).reshape(Cin, total_q)     # (Cin, N*M2)
    xf = jnp.pad(xf, ((0, 0), (0, Mfp - total_q)))                 # (Cin, Mfp)

    # ---- per-tap parity-plane weight blocks w4[t][(pa,pb,co), ci] -----------------------
    # Parity plane (pa, pb) at plane coords (a, b) is full-output pixel (2a+pa, 2b+pb):
    # kh = 1 if pa==1 else 2*dh ; kw = 1 if pb==1 else 2*dw ; taps with pa==1&dh==1
    # (or pb==1&dw==1) contribute nothing.
    tap_blocks = []
    for dh in range(2):
        for dw in range(2):
            rows = []
            for pa in range(2):
                for pb in range(2):
                    if (pa == 1 and dh == 1) or (pb == 1 and dw == 1):
                        rows.append(jnp.zeros((Cout, Cin), jnp.float32))
                    else:
                        kh = 1 if pa == 1 else 2 * dh
                        kw = 1 if pb == 1 else 2 * dw
                        rows.append(w_t[:, :, kh, kw].astype(jnp.float32).T)  # (Cout, Cin)
            tap_blocks.append(jnp.concatenate(rows, axis=0))                  # (4*Cout, Cin)
    w4 = jnp.stack(tap_blocks, axis=0).astype(jnp.bfloat16)                   # (4,4*Cout,Cin)
    bias4 = jnp.tile(b.astype(jnp.float32), 4).reshape(4 * Cout, 1)

    # Tap (dh, dw) = x[a-dh, b-dw] = xf[q + (1-dh)*(W+2) + (1-dw)], q = image_off + a*Wp + b.
    shifts = (Wp + 1, Wp, 1, 0)              # t = 2*dh + dw order

    out_g = _parity_gemm(w4, bias4, xf, tm=tm, th=th, ng=ng, shifts=shifts)  # (4*Cout, ng*tm)

    # ---- epilogue: one parity interleave (reshape/transpose), crop once, concat skip ----
    planes = out_g[:, :total_q].reshape(2, 2, Cout, N, H + 2, Wp)[:, :, :, :, :H + 1, :W + 1]
    inter = jnp.transpose(planes, (3, 2, 4, 0, 5, 1)).reshape(N, Cout, 2 * H + 2, 2 * W + 2)
    crop = inter[:, :, r0:r0 + Hs, c0:c0 + Ws].astype(out_dtype)
    return jnp.concatenate([crop, skip_nchw.astype(out_dtype)], axis=1)


# --------------------- independent numpy reference (scatter-add) -------------
def _ref_numpy(x, skip, w_t, b):
    x = np.asarray(x, np.float32)
    skip = np.asarray(skip, np.float32)
    w = np.asarray(w_t, np.float32)
    bb = np.asarray(b, np.float32)
    N, Cin, H, W = x.shape
    _, Cskip, Hs, Ws = skip.shape
    Cout = w.shape[1]
    Hf, Wf = 2 * H + 1, 2 * W + 1
    full = np.zeros((N, Cout, Hf, Wf), np.float32) + bb[None, :, None, None]
    for kh in range(3):
        for kw in range(3):
            full[:, :, kh:kh + 2 * H:2, kw:kw + 2 * W:2] += np.einsum(
                "nihw,io->nohw", x, w[:, :, kh, kw])
    r0 = (Hf - Hs) // 2
    c0 = (Wf - Ws) // 2
    crop = full[:, :, r0:r0 + Hs, c0:c0 + Ws]
    return np.concatenate([crop, skip], axis=1)


# ------------------------------ main -----------------------------------------
if __name__ == "__main__":
    configs = [
        # N, Cin, H, W, Cout, Cskip, Hs, Ws   (full convT output is (2H+1, 2W+1))
        dict(N=2, Cin=4, H=8, W=8, Cout=8, Cskip=6, Hs=15, Ws=15),  # odd crop offsets
        dict(N=1, Cin=8, H=6, W=5, Cout=4, Cskip=3, Hs=13, Ws=9),   # H!=W, r0=0, c0=1
    ]
    key = jax.random.PRNGKey(0)
    for cfg in configs:
        key, kx, ks, kw, kb = jax.random.split(key, 5)
        x = jax.random.normal(kx, (cfg["N"], cfg["Cin"], cfg["H"], cfg["W"]), jnp.float32)
        skip = jax.random.normal(ks, (cfg["N"], cfg["Cskip"], cfg["Hs"], cfg["Ws"]),
                                 jnp.float32)
        w_t = jax.random.normal(kw, (cfg["Cin"], cfg["Cout"], 3, 3), jnp.float32) * 0.1
        b = jax.random.normal(kb, (cfg["Cout"],), jnp.float32) * 0.1

        out = jax.block_until_ready(transition_up(x, skip, w_t, b))
        ref = _ref_numpy(x, skip, w_t, b)

        assert out.shape == ref.shape, (out.shape, ref.shape)
        # bf16 MXU inputs + bf16 output store (f32 accumulation) -> loose-ish tolerance
        np.testing.assert_allclose(np.asarray(out, np.float32), ref, rtol=2e-2, atol=2e-2)

    print("KERNEL_OK")
</pallas_src>

<mosaic_0001>
module attributes {stable_mosaic.version = 11 : i64} {
  func.func @kernel(%arg0: i32, %arg1: memref<4x32x4xbf16, #tpu.memory_space<vmem>>, %arg2: memref<32x1xf32, #tpu.memory_space<vmem>>, %arg3: memref<4x128xbf16, #tpu.memory_space<vmem>>, %arg4: memref<4x128xbf16, #tpu.memory_space<vmem>>, %arg5: memref<32x128xbf16, #tpu.memory_space<vmem>>) attributes {dimension_semantics = [#tpu.dimension_semantics<parallel>], iteration_bounds = array<i64: 2>, scalar_prefetch = 0 : i64, scratch_operands = 0 : i64, tpu.core_type = #tpu.core_type<tc>, window_params = [{pipeline_mode = #tpu.pipeline_mode<synchronous>, transform_indices = @transform_0, window_bounds = array<i64: 4, 32, 4>}, {pipeline_mode = #tpu.pipeline_mode<synchronous>, transform_indices = @transform_1, window_bounds = array<i64: 32, 1>}, {transform_indices = @transform_2, window_bounds = array<i64: 4, 128>}, {transform_indices = @transform_3, window_bounds = array<i64: 4, 128>}, {transform_indices = @transform_4, window_bounds = array<i64: 32, 128>}]} {
    %c0 = arith.constant 0 : index
    %c0_0 = arith.constant 0 : index
    %0 = vector.load %arg3[%c0, %c0_0] : memref<4x128xbf16, #tpu.memory_space<vmem>>, vector<4x128xbf16>
    %c0_1 = arith.constant 0 : index
    %c0_2 = arith.constant 0 : index
    %1 = vector.load %arg4[%c0_1, %c0_2] : memref<4x128xbf16, #tpu.memory_space<vmem>>, vector<4x128xbf16>
    %2 = tpu.concatenate %0, %1 in 1 : vector<4x128xbf16>, vector<4x128xbf16> -> vector<4x256xbf16>
    %cst = arith.constant 0.000000e+00 : f32
    %3 = vector.broadcast %cst : f32 to vector<32x128xf32>
    %c0_3 = arith.constant 0 : index
    %c0_4 = arith.constant 0 : index
    %c0_5 = arith.constant 0 : index
    %4 = vector.load %arg1[%c0_3, %c0_4, %c0_5] : memref<4x32x4xbf16, #tpu.memory_space<vmem>>, vector<1x32x4xbf16>
    %5 = vector.shape_cast %4 : vector<1x32x4xbf16> to vector<32x4xbf16>
    %6 = vector.extract_strided_slice %2 {offsets = [0, 11], sizes = [4, 128], strides = [1, 1]} : vector<4x256xbf16> to vector<4x128xbf16>
    %cst_6 = arith.constant dense<0.000000e+00> : vector<32x128xf32>
    %7 = tpu.matmul %5, %6, %cst_6 {dimension_numbers = #tpu.dot_dimension_numbers<[1], [0], [0], [1], [0, 0, 1, 1], [], []>} : vector<32x4xbf16>, vector<4x128xbf16>, vector<32x128xf32> -> vector<32x128xf32>
    %8 = arith.addf %3, %7 : vector<32x128xf32>
    %c1 = arith.constant 1 : index
    %c0_7 = arith.constant 0 : index
    %c0_8 = arith.constant 0 : index
    %9 = vector.load %arg1[%c1, %c0_7, %c0_8] : memref<4x32x4xbf16, #tpu.memory_space<vmem>>, vector<1x32x4xbf16>
    %10 = vector.shape_cast %9 : vector<1x32x4xbf16> to vector<32x4xbf16>
    %11 = vector.extract_strided_slice %2 {offsets = [0, 10], sizes = [4, 128], strides = [1, 1]} : vector<4x256xbf16> to vector<4x128xbf16>
    %cst_9 = arith.constant dense<0.000000e+00> : vector<32x128xf32>
    %12 = tpu.matmul %10, %11, %cst_9 {dimension_numbers = #tpu.dot_dimension_numbers<[1], [0], [0], [1], [0, 0, 1, 1], [], []>} : vector<32x4xbf16>, vector<4x128xbf16>, vector<32x128xf32> -> vector<32x128xf32>
    %13 = arith.addf %8, %12 : vector<32x128xf32>
    %c2 = arith.constant 2 : index
    %c0_10 = arith.constant 0 : index
    %c0_11 = arith.constant 0 : index
    %14 = vector.load %arg1[%c2, %c0_10, %c0_11] : memref<4x32x4xbf16, #tpu.memory_space<vmem>>, vector<1x32x4xbf16>
    %15 = vector.shape_cast %14 : vector<1x32x4xbf16> to vector<32x4xbf16>
    %16 = vector.extract_strided_slice %2 {offsets = [0, 1], sizes = [4, 128], strides = [1, 1]} : vector<4x256xbf16> to vector<4x128xbf16>
    %cst_12 = arith.constant dense<0.000000e+00> : vector<32x128xf32>
    %17 = tpu.matmul %15, %16, %cst_12 {dimension_numbers = #tpu.dot_dimension_numbers<[1], [0], [0], [1], [0, 0, 1, 1], [], []>} : vector<32x4xbf16>, vector<4x128xbf16>, vector<32x128xf32> -> vector<32x128xf32>
    %18 = arith.addf %13, %17 : vector<32x128xf32>
    %c3 = arith.constant 3 : index
    %c0_13 = arith.constant 0 : index
    %c0_14 = arith.constant 0 : index
    %19 = vector.load %arg1[%c3, %c0_13, %c0_14] : memref<4x32x4xbf16, #tpu.memory_space<vmem>>, vector<1x32x4xbf16>
    %20 = vector.shape_cast %19 : vector<1x32x4xbf16> to vector<32x4xbf16>
    %21 = vector.extract_strided_slice %2 {offsets = [0, 0], sizes = [4, 128], strides = [1, 1]} : vector<4x256xbf16> to vector<4x128xbf16>
    %cst_15 = arith.constant dense<0.000000e+00> : vector<32x128xf32>
    %22 = tpu.matmul %20, %21, %cst_15 {dimension_numbers = #tpu.dot_dimension_numbers<[1], [0], [0], [1], [0, 0, 1, 1], [], []>} : vector<32x4xbf16>, vector<4x128xbf16>, vector<32x128xf32> -> vector<32x128xf32>
    %23 = arith.addf %18, %22 : vector<32x128xf32>
    %c0_16 = arith.constant 0 : index
    %c0_17 = arith.constant 0 : index
    %24 = vector.load %arg2[%c0_16, %c0_17] : memref<32x1xf32, #tpu.memory_space<vmem>>, vector<32x1xf32>
    %25 = vector.broadcast %24 : vector<32x1xf32> to vector<32x128xf32>
    %26 = arith.addf %23, %25 : vector<32x128xf32>
    %27 = arith.truncf %26 : vector<32x128xf32> to vector<32x128xbf16>
    %c0_18 = arith.constant 0 : index
    %c0_19 = arith.constant 0 : index
    %28 = vector.load %arg5[%c0_18, %c0_19] : memref<32x128xbf16, #tpu.memory_space<vmem>>, vector<32x128xbf16>
    tpu.vector_store %arg5[%c0_18, %c0_19], %27 {strides = array<i32>} : memref<32x128xbf16, #tpu.memory_space<vmem>>, vector<32x128xbf16>,
    return
  }
  func.func @transform_0(%arg0: i32) -> (i32, i32, i32) {
    %c0_i32 = arith.constant 0 : i32
    %c0_i32_0 = arith.constant 0 : i32
    %c0_i32_1 = arith.constant 0 : i32
    %c0_i32_2 = arith.constant 0 : i32
    return %c0_i32, %c0_i32_0, %c0_i32_1 : i32, i32, i32
  }
  func.func @transform_1(%arg0: i32) -> (i32, i32) {
    %c0_i32 = arith.constant 0 : i32
    %c0_i32_0 = arith.constant 0 : i32
    %c0_i32_1 = arith.constant 0 : i32
    return %c0_i32, %c0_i32_0 : i32, i32
  }
  func.func @transform_2(%arg0: i32) -> (i32, i32) {
    %c0_i32 = arith.constant 0 : i32
    %c0_i32_0 = arith.constant 0 : i32
    return %c0_i32, %arg0 : i32, i32
  }
  func.func @transform_3(%arg0: i32) -> (i32, i32) {
    %c1_i32 = arith.constant 1 : i32
    %0 = arith.addi %arg0, %c1_i32 : i32
    %c1_i32_0 = arith.constant 1 : i32
    %1 = arith.muli %0, %c1_i32_0 : i32
    %c0_i32 = arith.constant 0 : i32
    %c0_i32_1 = arith.constant 0 : i32
    return %c0_i32, %1 : i32, i32
  }
  func.func @transform_4(%arg0: i32) -> (i32, i32) {
    %c0_i32 = arith.constant 0 : i32
    %c0_i32_0 = arith.constant 0 : i32
    return %c0_i32, %arg0 : i32, i32
  }
}

</mosaic_0001>

<bundles_post_ra>
// kernel: tile.8
= control target key start
LH: loop header
LB: loop body
LE: loop exit
PB: predicated region body
PF: predicated region fallthrough
CT: control target
= control target key end

     0   :  { %s22_s0 = inlined_call_operand.vmem [shape: f32[8], index: 0, kind: input, shape index: {}]   ;;  %s23_s1 = inlined_call_operand.vmem [shape: f32[4,8], index: 1, kind: output, shape index: {}]  }
   0x1   :  { %v4_v0 = vld [vmem:[%s22_s0] ss:$0 sm:$0xff] }
   0x2   :  { %5 = vst [vmem:[%s23_s1] sm:$0xf] %v4_v0 }

// kernel: tile.0
= control target key start
LH: loop header
LB: loop body
LE: loop exit
PB: predicated region body
PF: predicated region fallthrough
CT: control target
= control target key end

     0   :  { %s66_s8 = smov 125   ;;  %s67_s9 = smov 123   ;;  %vm7_vm0 = vcmask 7168   ;;  %s117_s0 = inlined_call_operand.vmem [shape: f32[4,8], index: 0, kind: input, shape index: {}]   ;;  %s118_s1 = inlined_call_operand.vmem [shape: f32[32,1], index: 1, kind: output, shape index: {}]  }
   0x1   :  { %v4_v0 = vld [vmem:[%s117_s0] sm:$0xf]  ;;  %s65_s0 = smov 127   ;;  %s68_s10 = smov 126  }
   0x2   :  { %5 = vst [vmem:[#allocation0] sm:$0xf] %v4_v0  ;;  %s69_s11 = smov 124   ;;  %s70_s12 = smov 122  }
   0x3   :  { %s71_s13 = smov 121  }
   0x9   :  { %v9_v1 = vld [vmem:[#allocation0] sm:$0xf]  }
   0xa   :  { %v21_v2 = vld [vmem:[#allocation0] sm:$0xf]   ;;  %10 = vrot.lane.b32.xlu0 %v9_v1, %s65_s0 }
   0xb   :  { %22 = vrot.lane.b32.xlu1 %v21_v2, %s66_s8  ;;  %v33_v3 = vld [vmem:[#allocation0] sm:$0xf]  }
   0xc   :  { %34 = vrot.lane.b32.xlu2 %v33_v3, %s67_s9  ;;  %v15_v4 = vld [vmem:[#allocation0] sm:$0xf]  }
   0xd   :  { %v27_v5 = vld [vmem:[#allocation0] sm:$0xf]  }
   0xe   :  { %v39_v6 = vld [vmem:[#allocation0] sm:$0xf]  }
   0xf   :  { %v45_v7 = vld [vmem:[#allocation0] sm:$0xf]  }
  0x10   :  { %v6_v8 = vld [vmem:[#allocation0] sm:$0xf]  }
  0x11   :  { %8 = vst.msk [vmem:[%s118_s1] ss:$8 sm:$0xf] %vm7_vm0, %v6_v8  }
  0x12   :  { %16 = vrot.lane.b32.xlu0 %v15_v4, %s68_s10 }
  0x13   :  { %28 = vrot.lane.b32.xlu1 %v27_v5, %s69_s11 }
  0x14   :  { %40 = vrot.lane.b32.xlu2 %v39_v6, %s70_s12 }
  0x1a   :  { %46 = vrot.lane.b32.xlu0 %v45_v7, %s71_s13 }
  0x66   :  { %v35_v9 = vpop.permute.xlu2 %34  }
  0x67   :  { %55 = vst.msk [vmem:[%s118_s1 + $0x5] ss:$8 sm:$0xf] %vm7_vm0, %v35_v9  }
  0x6e   :  { %v41_v10 = vpop.permute.xlu2 %40  }
  0x6f   :  { %56 = vst.msk [vmem:[%s118_s1 + $0x6] ss:$8 sm:$0xf] %vm7_vm0, %v41_v10  }
  0x7c   :  { %v11_v11 = vpop.permute.xlu0 %10  }
  0x7d   :  { %v23_v12 = vpop.permute.xlu1 %22   ;;  %51 = vst.msk [vmem:[%s118_s1 + $0x1] ss:$8 sm:$0xf] %vm7_vm0, %v11_v11  }
  0x7e   :  { %53 = vst.msk [vmem:[%s118_s1 + $0x3] ss:$8 sm:$0xf] %vm7_vm0, %v23_v12  }
  0x84   :  { %v17_v13 = vpop.permute.xlu0 %16  }
  0x85   :  { %v29_v14 = vpop.permute.xlu1 %28   ;;  %52 = vst.msk [vmem:[%s118_s1 + $0x2] ss:$8 sm:$0xf] %vm7_vm0, %v17_v13  }
  0x86   :  { %54 = vst.msk [vmem:[%s118_s1 + $0x4] ss:$8 sm:$0xf] %vm7_vm0, %v29_v14  }
  0x8c   :  { %v47_v15 = vpop.permute.xlu0 %46  }
  0x8d   :  { %57 = vst.msk [vmem:[%s118_s1 + $0x7] ss:$8 sm:$0xf] %vm7_vm0, %v47_v15  }

// kernel: transition_up.1
= control target key start
LH: loop header
LB: loop body
LE: loop exit
PB: predicated region body
PF: predicated region fallthrough
CT: control target
= control target key end

     0   :  { %s744_s15 = smov 0   ;;  %s746_s16 = smov 0   ;;  %s847_s0 = inlined_call_operand.vmem [shape: bf16[4,32,4], index: 0, kind: input, shape index: {}]   ;;  %s848_s1 = inlined_call_operand.vmem [shape: f32[32,1], index: 1, kind: input, shape index: {}]   ;;  %s849_s2 = inlined_call_operand.vmem [shape: bf16[4,384], index: 2, kind: input, shape index: {}, may-alias: {2,3}]   ;;  %s850_s3 = inlined_call_operand.vmem [shape: bf16[4,384], index: 3, kind: input, shape index: {}, may-alias: {2,3}]   ;;  %s851_s4 = inlined_call_operand.vmem [shape: bf16[32,256], index: 4, kind: output, shape index: {}]  }
   0x1   :  { %s748_s17 = smov 0  }
   0x2 LB: > { %s757_s18 = sadd.s32 4294967295, %s713_s17   ;;  %s759_s19 = sadd.s32 1, %s713_s17   ;;  %s713_s17 = sphi %s748_s17, %s855_s17   ;;  %s709_s16 = sphi %s746_s16, %s854_s16   ;;  %s705_s15 = sphi %s744_s15, %s853_s15  }
   0x3   : > { %s114_s20 = ssub.s32 %s713_s17, %s759_s19  ;;  %s117_s21 = sadd.s32 1, %s709_s16 }
   0x4   : > { %p115_p0 = scmp.eq.s32.totalorder %s114_s20, 0  ;;  %p127_p1 = scmp.ne.s32.totalorder %s709_s16, %s705_s15 }
   0x5   : > { %p128_p2 = scmp.eq.s32.totalorder %s757_s18, 1  ;;  %p581_p3 = scmp.ge.s32.totalorder %s713_s17, 1 }
   0x6   : > { %s767_s22 = scalar_select %p115_p0, %s709_s16, %s117_s21  }
   0x7   : > { %p769_p4 = por %p128_p2, %p127_p1  ;;  %p174_p5 = scmp.lt.s32.totalorder %s713_s17, 3 }
   0x9   : > { %p175_p6 = pnand %p581_p3, %p174_p5 }
   0xa   : > { %p203_p7 = scmp.lt.s32.totalorder (!%p175_p6), %s757_s18, 2  ;;  %s207_s24 = sadd.s32 (!%p175_p6), 1, %s757_s18 }
   0xb   : > { %178 = sbr.rel (%p175_p6) target bundleno = 323 (0x143), region = 36  ;;  %p208_p8 = scmp.lt.s32.totalorder (!%p175_p6), %s207_s24, 2 }
   0xc   : > { %s715_s30 = smov (!%p175_p6), 118   ;;  %s716_s5 = smov (!%p175_p6), 127  }
   0xd   : > { %s717_s7 = smov (!%p175_p6), 117   ;;  %s200_s17 = sand.u32 (!%p175_p6), 1, %s705_s15  }
   0xe   : > { %s582_s20 = sshll.u32 (!%p175_p6), %s200_s17, 4 }
   0xf   : > { %s202_s21 = scalar_lea.vmem (!%p175_p6), [#allocation2], %s582_s20 }
  0x10   : > { %s204_s25 = scalar_select %p203_p7, %s757_s18, 2  ;;  %vm250_vm0 = vcmask 1041408   ;;  %v647_v3 = vld [vmem:[%s847_s0 + $0x30] sm:$0xff]  ;;  %vm243_vm1 = vcmask 31744   ;;  %vm287_vm2 = vcmask 957440   ;;  %v641_v8 = vld [vmem:[%s847_s0] sm:$0xff] }
  0x11   : > { %s857_s24 = smov (!%p208_p8, %s207_s24), 2  ;;  %v648_v9 = vld [vmem:[%s847_s0 + $0x38] sm:$0xff]  ;;  %v417_v10 = vld [vmem:[%s848_s1] sm:$0xff]  ;;  %v418_v11 = vld [vmem:[%s848_s1 + $0x8] sm:$0xff]  ;;  %v718_v12 = vmov 0   ;;  %vm241_vm3 = vcmask 965632  }
  0x12   : > { %s583_s26 = sshll.u32 %s204_s25, 1  ;;  %s584_s6 = sshll.u32 %s857_s24, 1  ;;  %688 = vset.pattern.permute.xlu0 %v718_v12  ;;  %689 = vset.pattern.permute.xlu1 %v718_v12  ;;  %v419_v13 = vld [vmem:[%s848_s1 + $0x10] sm:$0xff]  ;;  %v642_v16 = vld [vmem:[%s847_s0 + $0x8] sm:$0xff]  ;;  %v420_v17 = vld [vmem:[%s848_s1 + $0x18] sm:$0xff]  ;;  %vm336_vm4 = vcmask 1039360  }
  0x13   : > { %s206_s29 = scalar_lea.vmem %s849_s2, %s583_s26  ;;  %s211_s10 = scalar_lea.vmem %s850_s3, %s584_s6  ;;  %690 = vset.pattern.permute.xlu2 %v718_v12  ;;  %v643_v24 = vld [vmem:[%s847_s0 + $0x10] sm:$0xff]  ;;  %v645_v25 = vld [vmem:[%s847_s0 + $0x20] sm:$0xff]  ;;  %v644_v26 = vld [vmem:[%s847_s0 + $0x18] sm:$0xff] }
  0x14   : > { %v214_v0 = vld [vmem:[%s206_s29] sm:$0x3]  ;;  %v646_v27 = vld [vmem:[%s847_s0 + $0x28] sm:$0xff]  ;;  %s638_s15 = sshll.u32 (%p769_p4), %s757_s18, 2 }
  0x15   : > { %237 = vrot.lane.b32.xlu1 %v214_v0, %s715_s30  ;;  %332 = vrot.lane.b32.xlu0 %v214_v0, %s716_s5  ;;  %v215_v1 = vld [vmem:[%s211_s10] sm:$0x3]  ;;  %v392_v2 = vsel %vm250_vm0, %v214_v0, 0  ;;  %s461_s26 = scalar_lea.vmem (%p769_p4), %s851_s4, %s638_s15 }
  0x16   : > { %283 = vrot.lane.b32.xlu2 %v214_v0, %s717_s7  ;;  %401 = vmatpush.bf16.msra.mxu3 %v392_v2 }
  0x19   : > { %635 = vmatmul.msk.bf16.vlgmr.msra.gmra.mxu3 %vm243_vm1, %v647_v3 }
  0x1d   : > { %239 = vrot.lane.b32.xlu1 %v215_v1, %s715_s30  ;;  %334 = vrot.lane.b32.xlu0 %v215_v1, %s716_s5 }
  0x1e   : > { %285 = vrot.lane.b32.xlu2 %v215_v1, %s717_s7 }
  0x25   : > { %423 = vperm.xlu0 %688, %v417_v10   ;;  %428 = vperm.xlu1 %689, %v418_v11  }
  0x26   : > { %433 = vperm.xlu2 %690, %v419_v13  }
  0x29   : > { %636 = vmatmul.msk.bf16.gmra.mxu3 %vm243_vm1, %v648_v9 }
  0x2d   : > { %438 = vperm.xlu1 %689, %v420_v17  }
  0x70   : > { %v284_v4 = vpop.permute.xlu2 %283 }
  0x78   : > { %v286_v5 = vpop.permute.xlu2 %285 }
  0x79   : > { %v288_v6 = vsel %vm287_vm2, %v284_v4, %v286_v5 }
  0x7a   : > { %v296_v7 = vsel %vm250_vm0, %v288_v6, 0 }
  0x7b   : > { %305 = vmatpush.bf16.msra.mxu1 %v296_v7 }
  0x7e   : > { %607 = vmatmul.msk.bf16.vlgmr.msra.gmra.mxu1 %vm243_vm1, %v641_v8 }
  0x80   : > { %v434_v60 = vpop.permute.xlu2 %433 }
  0x87   : > { %v238_v14 = vpop.permute.xlu1 %237  ;;  %v333_v15 = vpop.permute.xlu0 %332 }
  0x8e   : > { %608 = vmatmul.msk.bf16.gmra.mxu1 %vm243_vm1, %v642_v16 }
  0x8f   : > { %v240_v18 = vpop.permute.xlu1 %239  ;;  %v335_v19 = vpop.permute.xlu0 %334 }
  0x90   : > { %v242_v20 = vsel %vm241_vm3, %v238_v14, %v240_v18  ;;  %v337_v21 = vsel %vm336_vm4, %v333_v15, %v335_v19 }
  0x91   : > { %v252_v22 = vsel %vm250_vm0, %v242_v20, 0  ;;  %v345_v23 = vsel %vm250_vm0, %v337_v21, 0 }
  0x92   : > { %261 = vmatpush.bf16.msra.mxu0 %v252_v22  ;;  %354 = vmatpush.bf16.msra.mxu2 %v345_v23 }
  0x95   : > { %597 = vmatmul.msk.bf16.vlgmr.msra.gmra.mxu0 %vm243_vm1, %v643_v24  ;;  %621 = vmatmul.msk.bf16.vlgmr.msra.gmra.mxu2 %vm243_vm1, %v645_v25 }
  0x97   : > { %v424_v39 = vpop.permute.xlu0 %423  ;;  %v429_v43 = vpop.permute.xlu1 %428 }
  0x9c   : > { %v403_v30 = vpop.f32.mrf.mxu3 }
  0x9f   : > { %v439_v62 = vpop.permute.xlu1 %438 }
  0xa4   : > { %v405_v36 = vpop.f32.mrf.mxu3 }
  0xa5   : > { %598 = vmatmul.msk.bf16.gmra.mxu0 %vm243_vm1, %v644_v26  ;;  %622 = vmatmul.msk.bf16.gmra.mxu2 %vm243_vm1, %v646_v27 }
  0xac   : > { %v408_v49 = vpop.f32.mrf.mxu3 }
  0xb4   : > { %v410_v59 = vpop.f32.mrf.mxu3 }
  0xfb   : > { %v307_v28 = vpop.f32.mrf.mxu1 }
 0x103   : > { %v309_v33 = vpop.f32.mrf.mxu1 }
 0x10b   : > { %v312_v45 = vpop.f32.mrf.mxu1 }
 0x112   : > { %v263_v29 = vpop.f32.mrf.mxu0 }
 0x113   : > { %v308_v32 = vadd.f32 %v307_v28, %v263_v29  ;;  %v314_v54 = vpop.f32.mrf.mxu1 }
 0x118   : > { %v356_v31 = vpop.f32.mrf.mxu2 }
 0x119   : > { %v366_v35 = vadd.f32 %v356_v31, %v308_v32 }
 0x11a   : > { %v265_v34 = vpop.f32.mrf.mxu0 }
 0x11b   : > { %v310_v37 = vadd.f32 %v309_v33, %v265_v34  ;;  %v413_v40 = vadd.f32 %v403_v30, %v366_v35 }
 0x11d   : > { %v441_v46 = vadd.f32 %v424_v39, %v413_v40 }
 0x120   : > { %v358_v38 = vpop.f32.mrf.mxu2 }
 0x121   : > { %v367_v41 = vadd.f32 %v358_v38, %v310_v37 }
 0x122   : > { %v268_v42 = vpop.f32.mrf.mxu0 }
 0x123   : > { %v414_v44 = vadd.f32 %v405_v36, %v367_v41  ;;  %v313_v51 = vadd.f32 %v312_v45, %v268_v42 }
 0x125   : > { %v442_v47 = vadd.f32 %v429_v43, %v414_v44 }
 0x127   : > { %v652_v48 = vpack.c.bf16 %v442_v47, %v441_v46 }
 0x128   : > { %v361_v50 = vpop.f32.mrf.mxu2 }
 0x129   : > { %653 = vst [vmem:[%s202_s21] sm:$0xff] %v652_v48   ;;  %v368_v53 = vadd.f32 %v361_v50, %v313_v51 }
 0x12a   : > { %v270_v52 = vpop.f32.mrf.mxu0 }
 0x12b   : > { %v315_v55 = vadd.f32 %v314_v54, %v270_v52  ;;  %v415_v57 = vadd.f32 %v408_v49, %v368_v53 }
 0x12d   : > { %v443_v63 = vadd.f32 %v434_v60, %v415_v57 }
 0x130   : > { %v363_v56 = vpop.f32.mrf.mxu2  ;;  %v478_v2 = vld [vmem:[%s202_s21] sm:$0xf] (%p769_p4)  ;;  %v480_v3 = vld [vmem:[%s202_s21 + $0x4] sm:$0xf] (%p769_p4) }
 0x131   : > { %v369_v58 = vadd.f32 %v363_v56, %v315_v55  ;;  %479 = vst [vmem:[%s461_s26] sm:$0xf] (%p769_p4), %v478_v2 }
 0x132   : > { %481 = vst [vmem:[%s461_s26 + $0x8] sm:$0xf] (%p769_p4), %v480_v3 }
 0x133   : > { %v416_v61 = vadd.f32 %v410_v59, %v369_v58 }
 0x135   : > { %v444_v0 = vadd.f32 %v439_v62, %v416_v61  ;;  %459 = sbr.rel (!%p769_p4) target bundleno = 323 (0x143), region = 40 }
 0x137   : > { %v657_v1 = vpack.c.bf16 %v444_v0, %v443_v63 }
 0x139   : > { %659 = vst [vmem:[%s202_s21 + $0x8] sm:$0xff] %v657_v1  }
 0x140   : > { %v482_v4 = vld [vmem:[%s202_s21 + $0x8] sm:$0xf]  ;;  %v484_v5 = vld [vmem:[%s202_s21 + $0xc] sm:$0xf] }
 0x141   : > { %483 = vst [vmem:[%s461_s26 + $0x10] sm:$0xf] %v482_v4 }
 0x142   : > { %485 = vst [vmem:[%s461_s26 + $0x18] sm:$0xf] %v484_v5 }
 0x143 PF: > { %p11_p9 = scmp.ge.s32.totalorder %s759_s19, 4   ;;  %s853_s15 = smov %s709_s16 }
 0x144   : > { %s854_s16 = smov %s767_s22  ;;  %s855_s17 = smov %s759_s19 }
 0x145   :  { %13 = sbr.rel (!%p11_p9) target bundleno = 2 (0x2), region = 113 }

</bundles_post_ra>
